<compile_context>
chip_gen: v5e
topology: v5e:2x2
jax: 0.10.0
libtpu: 0.0.40
codegen_flags: <defaults>
</compile_context>

<pallas_src>
import functools

import jax
import jax.numpy as jnp
from jax.experimental import pallas as pl
from jax.experimental.pallas import tpu as pltpu

LANE = 128
SUBLANE = 8


def _round_up(x, m):
    return ((x + m - 1) // m) * m


def _input_index_map(p, s, *, steps_per_shard, num_blocks):
    # logical block index; clamp so duplicated tail blocks stay in-range
    # (their contribution is masked to zero inside the kernel).
    b = p * steps_per_shard + s
    return (jnp.minimum(b, num_blocks - 1), 0)


def _tversky_kernel(pred_ref, tgt_ref, out_ref, sp_acc, st_acc, tp_acc, *,
                    n_valid, tile_rows, steps_per_shard, needs_mask):
    s_id = pl.program_id(1)

    @pl.when(s_id == 0)
    def _init():
        sp_acc[...] = jnp.zeros_like(sp_acc)
        st_acc[...] = jnp.zeros_like(st_acc)
        tp_acc[...] = jnp.zeros_like(tp_acc)

    x = pred_ref[...].astype(jnp.float32)
    t = tgt_ref[...].astype(jnp.float32)
    # sigmoid(x) = 0.5 * tanh(0.5 * x) + 0.5  -- one EUP transcendental
    p = 0.5 * jnp.tanh(0.5 * x) + 0.5

    if needs_mask:
        b = pl.program_id(0) * steps_per_shard + s_id
        base = b * (tile_rows * LANE)
        row_ids = jax.lax.broadcasted_iota(jnp.int32, (tile_rows, LANE), 0)
        lane_ids = jax.lax.broadcasted_iota(jnp.int32, (tile_rows, LANE), 1)
        valid = (base + row_ids * LANE + lane_ids) < n_valid
        p = jnp.where(valid, p, 0.0)
        t = jnp.where(valid, t, 0.0)

    # whole-vreg accumulation: (tile_rows, 128) -> (k, 8, 128), reduce over
    # the leading (vreg-granular) axis only; no cross-sublane/lane work here.
    k = tile_rows // SUBLANE
    sp_acc[...] += jnp.sum(p.reshape(k, SUBLANE, LANE), axis=0)
    st_acc[...] += jnp.sum(t.reshape(k, SUBLANE, LANE), axis=0)
    tp_acc[...] += jnp.sum((p * t).reshape(k, SUBLANE, LANE), axis=0)

    @pl.when(s_id == pl.num_programs(1) - 1)
    def _finish():
        out_ref[0, :, 0:LANE] = sp_acc[...]
        out_ref[0, :, LANE:2 * LANE] = st_acc[...]
        out_ref[0, :, 2 * LANE:3 * LANE] = tp_acc[...]


def tversky_loss(pred, target, *, beta=0.7, smooth=1e-5,
                 tile_rows=1024, num_shards=2):
    """Pallas equivalent of TverskyLoss(beta, smooth)(pred, target)."""
    n = pred.size
    pred_flat = pred.reshape(-1)          # native dtype, no upcast here
    tgt_flat = target.reshape(-1)

    # Pad only to a LANE multiple if needed (<= 127 elements); padded / OOB
    # elements are masked to zero inside the kernel.
    rem = n % LANE
    if rem:
        pad = LANE - rem
        pred_flat = jnp.pad(pred_flat, (0, pad))
        tgt_flat = jnp.pad(tgt_flat, (0, pad))

    rows = pred_flat.shape[0] // LANE
    pred2 = pred_flat.reshape(rows, LANE)
    tgt2 = tgt_flat.reshape(rows, LANE)

    # Effective tile: multiple of 16 (bf16-safe sublane tiling), capped by the
    # data size; 1024 rows f32 = 512 KiB/block -> fits every chip's VMEM with
    # double buffering (well under v7x's 64 MiB).
    tr = max(16, min(int(tile_rows), _round_up(rows, 16)))
    tr = _round_up(tr, 16)

    num_blocks = pl.cdiv(rows, tr)
    shards = max(1, min(int(num_shards), num_blocks))
    steps = pl.cdiv(num_blocks, shards)

    # Masking is only compiled in when some block can contain invalid or
    # duplicated elements.
    needs_mask = (num_blocks * tr * LANE != n) or (shards * steps != num_blocks)

    kernel = functools.partial(
        _tversky_kernel,
        n_valid=n, tile_rows=tr, steps_per_shard=steps, needs_mask=needs_mask)

    in_map = functools.partial(
        _input_index_map, steps_per_shard=steps, num_blocks=num_blocks)

    itemsize = pred.dtype.itemsize + target.dtype.itemsize
    cost = pl.CostEstimate(
        flops=int(6 * n),
        transcendentals=int(n),
        bytes_accessed=int(n) * itemsize + shards * SUBLANE * 3 * LANE * 4)

    partials = pl.pallas_call(
        kernel,
        out_shape=jax.ShapeDtypeStruct((shards, SUBLANE, 3 * LANE), jnp.float32),
        grid_spec=pltpu.PrefetchScalarGridSpec(
            num_scalar_prefetch=0,
            grid=(shards, steps),
            in_specs=[
                pl.BlockSpec((tr, LANE), in_map),
                pl.BlockSpec((tr, LANE), in_map),
            ],
            out_specs=pl.BlockSpec((1, SUBLANE, 3 * LANE), lambda p, s: (p, 0, 0)),
            scratch_shapes=[
                pltpu.VMEM((SUBLANE, LANE), jnp.float32),
                pltpu.VMEM((SUBLANE, LANE), jnp.float32),
                pltpu.VMEM((SUBLANE, LANE), jnp.float32),
            ],
        ),
        compiler_params=pltpu.CompilerParams(
            dimension_semantics=("parallel", "arbitrary")),
        cost_estimate=cost,
    )(pred2, tgt2)

    # Tiny cross-shard / cross-lane combine + Tversky formula in plain JAX.
    sums = partials.reshape(shards, SUBLANE, 3, LANE).sum(axis=(0, 1, 3))
    sum_p, sum_t, tp = sums[0], sums[1], sums[2]
    fp = sum_p - tp
    fn = sum_t - tp
    tversky = (tp + smooth) / (tp + beta * fp + (1.0 - beta) * fn + smooth)
    return 1.0 - tversky


def tversky_loss_ref(pred, target, beta=0.7, smooth=1e-5):
    p = jax.nn.sigmoid(pred.reshape(-1).astype(jnp.float32))
    t = target.reshape(-1).astype(jnp.float32)
    tp = jnp.sum(p * t)
    fp = jnp.sum(p * (1.0 - t))
    fn = jnp.sum((1.0 - p) * t)
    tversky = (tp + smooth) / (tp + beta * fp + (1.0 - beta) * fn + smooth)
    return 1.0 - tversky


if __name__ == "__main__":
    key = jax.random.PRNGKey(0)
    k1, k2 = jax.random.split(key)

    # pred: raw logits, target: sparse binary mask (NCHW, as in PyTorch)
    pred = jax.random.normal(k1, (2, 4, 16, 16), dtype=jnp.float32)
    target = (jax.random.uniform(k2, (2, 4, 16, 16)) > 0.7).astype(jnp.float32)

    loss = tversky_loss(pred, target, beta=0.7, smooth=1e-5)
    loss = jax.block_until_ready(loss)

    ref = tversky_loss_ref(pred, target, beta=0.7, smooth=1e-5)
    assert jnp.allclose(loss, ref, rtol=1e-5, atol=1e-5), (loss, ref)

    print("KERNEL_OK")
</pallas_src>

<mosaic_0001>
module attributes {stable_mosaic.version = 11 : i64} {
  func.func @_tversky_kernel(%arg0: i32, %arg1: i32, %arg2: memref<16x128xf32, #tpu.memory_space<vmem>>, %arg3: memref<16x128xf32, #tpu.memory_space<vmem>>, %arg4: memref<1x8x384xf32, #tpu.memory_space<vmem>>, %arg5: memref<8x128xf32, #tpu.memory_space<vmem>>, %arg6: memref<8x128xf32, #tpu.memory_space<vmem>>, %arg7: memref<8x128xf32, #tpu.memory_space<vmem>>) attributes {dimension_semantics = [#tpu.dimension_semantics<parallel>, #tpu.dimension_semantics<arbitrary>], iteration_bounds = array<i64: 1, 1>, scalar_prefetch = 0 : i64, scratch_operands = 3 : i64, tpu.core_type = #tpu.core_type<tc>, window_params = [{transform_indices = @transform_0, window_bounds = array<i64: 16, 128>}, {transform_indices = @transform_1, window_bounds = array<i64: 16, 128>}, {transform_indices = @transform_2, window_bounds = array<i64: 1, 8, 384>}]} {
    %c0_i32 = arith.constant 0 : i32
    %0 = arith.cmpi eq, %arg1, %c0_i32 : i32
    %1 = arith.extui %0 : i1 to i32
    %c0_i32_0 = arith.constant 0 : i32
    %2 = arith.cmpi ne, %1, %c0_i32_0 : i32
    scf.if %2 {
      %cst_23 = arith.constant 0.000000e+00 : f32
      %31 = vector.broadcast %cst_23 : f32 to vector<8x128xf32>
      %c0_24 = arith.constant 0 : index
      %c0_25 = arith.constant 0 : index
      %32 = vector.load %arg5[%c0_24, %c0_25] : memref<8x128xf32, #tpu.memory_space<vmem>>, vector<8x128xf32>
      tpu.vector_store %arg5[%c0_24, %c0_25], %31 {strides = array<i32>} : memref<8x128xf32, #tpu.memory_space<vmem>>, vector<8x128xf32>,
      %cst_26 = arith.constant 0.000000e+00 : f32
      %33 = vector.broadcast %cst_26 : f32 to vector<8x128xf32>
      %c0_27 = arith.constant 0 : index
      %c0_28 = arith.constant 0 : index
      %34 = vector.load %arg6[%c0_27, %c0_28] : memref<8x128xf32, #tpu.memory_space<vmem>>, vector<8x128xf32>
      tpu.vector_store %arg6[%c0_27, %c0_28], %33 {strides = array<i32>} : memref<8x128xf32, #tpu.memory_space<vmem>>, vector<8x128xf32>,
      %cst_29 = arith.constant 0.000000e+00 : f32
      %35 = vector.broadcast %cst_29 : f32 to vector<8x128xf32>
      %c0_30 = arith.constant 0 : index
      %c0_31 = arith.constant 0 : index
      %36 = vector.load %arg7[%c0_30, %c0_31] : memref<8x128xf32, #tpu.memory_space<vmem>>, vector<8x128xf32>
      tpu.vector_store %arg7[%c0_30, %c0_31], %35 {strides = array<i32>} : memref<8x128xf32, #tpu.memory_space<vmem>>, vector<8x128xf32>,
    } else {
    }
    %c0 = arith.constant 0 : index
    %c0_1 = arith.constant 0 : index
    %3 = vector.load %arg2[%c0, %c0_1] : memref<16x128xf32, #tpu.memory_space<vmem>>, vector<16x128xf32>
    %c0_2 = arith.constant 0 : index
    %c0_3 = arith.constant 0 : index
    %4 = vector.load %arg3[%c0_2, %c0_3] : memref<16x128xf32, #tpu.memory_space<vmem>>, vector<16x128xf32>
    %cst = arith.constant 5.000000e-01 : f32
    %5 = vector.broadcast %cst : f32 to vector<16x128xf32>
    %6 = arith.mulf %5, %3 : vector<16x128xf32>
    %7 = math.tanh %6 : vector<16x128xf32>
    %cst_4 = arith.constant 5.000000e-01 : f32
    %8 = vector.broadcast %cst_4 : f32 to vector<16x128xf32>
    %9 = arith.mulf %8, %7 : vector<16x128xf32>
    %cst_5 = arith.constant 5.000000e-01 : f32
    %10 = vector.broadcast %cst_5 : f32 to vector<16x128xf32>
    %11 = arith.addf %9, %10 : vector<16x128xf32>
    %c0_6 = arith.constant 0 : index
    %c0_7 = arith.constant 0 : index
    %12 = vector.load %arg5[%c0_6, %c0_7] : memref<8x128xf32, #tpu.memory_space<vmem>>, vector<8x128xf32>
    %13 = vector.shape_cast %11 : vector<16x128xf32> to vector<2x8x128xf32>
    %cst_8 = arith.constant dense<0.000000e+00> : vector<8x128xf32>
    %14 = vector.multi_reduction <add>, %13, %cst_8 [0] : vector<2x8x128xf32> to vector<8x128xf32>
    %15 = arith.addf %12, %14 : vector<8x128xf32>
    %c0_9 = arith.constant 0 : index
    %c0_10 = arith.constant 0 : index
    %16 = vector.load %arg5[%c0_9, %c0_10] : memref<8x128xf32, #tpu.memory_space<vmem>>, vector<8x128xf32>
    tpu.vector_store %arg5[%c0_9, %c0_10], %15 {strides = array<i32>} : memref<8x128xf32, #tpu.memory_space<vmem>>, vector<8x128xf32>,
    %c0_11 = arith.constant 0 : index
    %c0_12 = arith.constant 0 : index
    %17 = vector.load %arg6[%c0_11, %c0_12] : memref<8x128xf32, #tpu.memory_space<vmem>>, vector<8x128xf32>
    %18 = vector.shape_cast %4 : vector<16x128xf32> to vector<2x8x128xf32>
    %cst_13 = arith.constant dense<0.000000e+00> : vector<8x128xf32>
    %19 = vector.multi_reduction <add>, %18, %cst_13 [0] : vector<2x8x128xf32> to vector<8x128xf32>
    %20 = arith.addf %17, %19 : vector<8x128xf32>
    %c0_14 = arith.constant 0 : index
    %c0_15 = arith.constant 0 : index
    %21 = vector.load %arg6[%c0_14, %c0_15] : memref<8x128xf32, #tpu.memory_space<vmem>>, vector<8x128xf32>
    tpu.vector_store %arg6[%c0_14, %c0_15], %20 {strides = array<i32>} : memref<8x128xf32, #tpu.memory_space<vmem>>, vector<8x128xf32>,
    %c0_16 = arith.constant 0 : index
    %c0_17 = arith.constant 0 : index
    %22 = vector.load %arg7[%c0_16, %c0_17] : memref<8x128xf32, #tpu.memory_space<vmem>>, vector<8x128xf32>
    %23 = arith.mulf %11, %4 : vector<16x128xf32>
    %24 = vector.shape_cast %23 : vector<16x128xf32> to vector<2x8x128xf32>
    %cst_18 = arith.constant dense<0.000000e+00> : vector<8x128xf32>
    %25 = vector.multi_reduction <add>, %24, %cst_18 [0] : vector<2x8x128xf32> to vector<8x128xf32>
    %26 = arith.addf %22, %25 : vector<8x128xf32>
    %c0_19 = arith.constant 0 : index
    %c0_20 = arith.constant 0 : index
    %27 = vector.load %arg7[%c0_19, %c0_20] : memref<8x128xf32, #tpu.memory_space<vmem>>, vector<8x128xf32>
    tpu.vector_store %arg7[%c0_19, %c0_20], %26 {strides = array<i32>} : memref<8x128xf32, #tpu.memory_space<vmem>>, vector<8x128xf32>,
    %c0_i32_21 = arith.constant 0 : i32
    %28 = arith.cmpi eq, %arg1, %c0_i32_21 : i32
    %29 = arith.extui %28 : i1 to i32
    %c0_i32_22 = arith.constant 0 : i32
    %30 = arith.cmpi ne, %29, %c0_i32_22 : i32
    scf.if %30 {
      %c0_23 = arith.constant 0 : index
      %c0_24 = arith.constant 0 : index
      %31 = vector.load %arg5[%c0_23, %c0_24] : memref<8x128xf32, #tpu.memory_space<vmem>>, vector<8x128xf32>
      %c0_25 = arith.constant 0 : index
      %c0_26 = arith.constant 0 : index
      %c0_27 = arith.constant 0 : index
      %32 = vector.load %arg4[%c0_25, %c0_26, %c0_27] : memref<1x8x384xf32, #tpu.memory_space<vmem>>, vector<1x8x128xf32>
      %33 = vector.shape_cast %32 : vector<1x8x128xf32> to vector<8x128xf32>
      %34 = vector.shape_cast %31 : vector<8x128xf32> to vector<1x8x128xf32>
      tpu.vector_store %arg4[%c0_25, %c0_26, %c0_27], %34 {strides = array<i32>} : memref<1x8x384xf32, #tpu.memory_space<vmem>>, vector<1x8x128xf32>,
      %c0_28 = arith.constant 0 : index
      %c0_29 = arith.constant 0 : index
      %35 = vector.load %arg6[%c0_28, %c0_29] : memref<8x128xf32, #tpu.memory_space<vmem>>, vector<8x128xf32>
      %c0_30 = arith.constant 0 : index
      %c0_31 = arith.constant 0 : index
      %c128 = arith.constant 128 : index
      %36 = vector.load %arg4[%c0_30, %c0_31, %c128] : memref<1x8x384xf32, #tpu.memory_space<vmem>>, vector<1x8x128xf32>
      %37 = vector.shape_cast %36 : vector<1x8x128xf32> to vector<8x128xf32>
      %38 = vector.shape_cast %35 : vector<8x128xf32> to vector<1x8x128xf32>
      tpu.vector_store %arg4[%c0_30, %c0_31, %c128], %38 {strides = array<i32>} : memref<1x8x384xf32, #tpu.memory_space<vmem>>, vector<1x8x128xf32>,
      %c0_32 = arith.constant 0 : index
      %c0_33 = arith.constant 0 : index
      %39 = vector.load %arg7[%c0_32, %c0_33] : memref<8x128xf32, #tpu.memory_space<vmem>>, vector<8x128xf32>
      %c0_34 = arith.constant 0 : index
      %c0_35 = arith.constant 0 : index
      %c256 = arith.constant 256 : index
      %40 = vector.load %arg4[%c0_34, %c0_35, %c256] : memref<1x8x384xf32, #tpu.memory_space<vmem>>, vector<1x8x128xf32>
      %41 = vector.shape_cast %40 : vector<1x8x128xf32> to vector<8x128xf32>
      %42 = vector.shape_cast %39 : vector<8x128xf32> to vector<1x8x128xf32>
      tpu.vector_store %arg4[%c0_34, %c0_35, %c256], %42 {strides = array<i32>} : memref<1x8x384xf32, #tpu.memory_space<vmem>>, vector<1x8x128xf32>,
    } else {
    }
    return
  }
  func.func @transform_0(%arg0: i32, %arg1: i32) -> (i32, i32) {
    %c1_i32 = arith.constant 1 : i32
    %0 = arith.muli %arg0, %c1_i32 : i32
    %1 = arith.addi %0, %arg1 : i32
    %c0_i32 = arith.constant 0 : i32
    %2 = arith.minsi %1, %c0_i32 : i32
    %c0_i32_0 = arith.constant 0 : i32
    %c0_i32_1 = arith.constant 0 : i32
    return %2, %c0_i32_0 : i32, i32
  }
  func.func @transform_1(%arg0: i32, %arg1: i32) -> (i32, i32) {
    %c1_i32 = arith.constant 1 : i32
    %0 = arith.muli %arg0, %c1_i32 : i32
    %1 = arith.addi %0, %arg1 : i32
    %c0_i32 = arith.constant 0 : i32
    %2 = arith.minsi %1, %c0_i32 : i32
    %c0_i32_0 = arith.constant 0 : i32
    %c0_i32_1 = arith.constant 0 : i32
    return %2, %c0_i32_0 : i32, i32
  }
  func.func @transform_2(%arg0: i32, %arg1: i32) -> (i32, i32, i32) {
    %c0_i32 = arith.constant 0 : i32
    %c0_i32_0 = arith.constant 0 : i32
    %c0_i32_1 = arith.constant 0 : i32
    return %arg0, %c0_i32, %c0_i32_0 : i32, i32, i32
  }
}

</mosaic_0001>

<bundles_post_ra>
// kernel: tpu_custom_call.1
= control target key start
LH: loop header
LB: loop body
LE: loop exit
PB: predicated region body
PF: predicated region fallthrough
CT: control target
= control target key end

     0   :  { %7 = vsyncpa [#allocation6], 0  ;;  %s244_s0 = inlined_call_operand.hbm [shape: f32[16,128], index: 0, kind: input, shape index: {}]   ;;  %s245_s1 = inlined_call_operand.hbm [shape: f32[16,128], index: 1, kind: input, shape index: {}]   ;;  %s246_s2 = inlined_call_operand.hbm [shape: f32[1,8,384], index: 2, kind: output, shape index: {}]  }
   0x1   :  { %8 = vsyncpa [#allocation9], 0 }
   0x2   :  { %9 = vsyncpa [#allocation7], 0  ;;  %s20_s11 = sshll.u32 %s244_s0, 4  ;;  %s215_s12 = smov [#allocation5]   ;;  %s21_s11 = int_to_ptr.hbm [resolvable:$true] %s20_s11 }
   0x3   :  { %s22_s13 = sshll.u32 %s215_s12, 4  ;;  %s39_s16 = sshll.u32 %s245_s1, 4  ;;  %s23_s13 = int_to_ptr.vmem [resolvable:$true] %s22_s13  ;;  %s40_s16 = int_to_ptr.hbm [resolvable:$true] %s39_s16 }
   0x4   :  { %s216_s17 = smov 128   ;;  %s217_s18 = smov 8  }
   0x5   :  { %28 = dma.hbm_to_vmem [thread:$0]  %s21_s11, 256, %s23_s13, [#allocation6], %s216_s17, %s216_s17, %s217_s18  }
   0x6   :  { %s218_s19 = smov [#allocation8]  }
   0x7   :  { %s41_s20 = sshll.u32 %s218_s19, 4  ;;  %s42_s20 = int_to_ptr.vmem [resolvable:$true] %s41_s20 }
   0x8   :  { %47 = dma.hbm_to_vmem [thread:$0]  %s40_s16, 256, %s42_s20, [#allocation9], %s216_s17, %s216_s17, %s217_s18  }
   0x9   :  { %209 = dma.done.wait [#allocation6], 256  }
   0xa   :  { %210 = vsyncadd [#allocation6], 4294967040 }
   0xb   :  { %211 = dma.done.wait [#allocation9], 256  }
   0xc   :  { %212 = vsyncadd [#allocation9], 4294967040  ;;  %v71_v0 = vld [vmem:[#allocation5] sm:$0xff]  ;;  %v72_v1 = vld [vmem:[#allocation5 + $0x8] sm:$0xff]  ;;  %s219_s0 = smov [#allocation10]   ;;  %s113_s23 = sshll.u32 %s246_s2, 4  ;;  %s114_s23 = int_to_ptr.hbm [resolvable:$true] %s113_s23 }
   0xd   :  { %v75_v2 = vmul.f32 0.5, %v71_v0  ;;  %v76_v3 = vmul.f32 0.5, %v72_v1  ;;  %v73_v4 = vld [vmem:[#allocation8] sm:$0xff]  ;;  %v74_v5 = vld [vmem:[#allocation8 + $0x8] sm:$0xff]  ;;  %s111_s1 = sshll.u32 %s219_s0, 4  ;;  %s112_s1 = int_to_ptr.vmem [resolvable:$true] %s111_s1 }
   0xe   :  { %v88_v6 = vadd.f32 %v74_v5, %v73_v4 }
   0xf   :  { %133 = vtanh.f32 %v75_v2 }
  0x10   :  { %135 = vtanh.f32 %v76_v3  ;;  %103 = vst [vmem:[#allocation10 + $0x8] sm:$0xff] %v88_v6 }
  0x15   :  { %v134_v7 = vpop.eup %133 }
  0x16   :  { %v136_v8 = vpop.eup %135  ;;  %v79_v9 = vmul.f32 0.5, %v134_v7 }
  0x17   :  { %v80_v10 = vmul.f32 0.5, %v136_v8 }
  0x18   :  { %v81_v11 = vadd.f32 0.5, %v79_v9 }
  0x19   :  { %v82_v12 = vadd.f32 0.5, %v80_v10 }
  0x1a   :  { %v92_v13 = vmul.f32 %v81_v11, %v73_v4 }
  0x1b   :  { %v84_v14 = vadd.f32 %v82_v12, %v81_v11  ;;  %v93_v15 = vmul.f32 %v82_v12, %v74_v5 }
  0x1d   :  { %101 = vst [vmem:[#allocation10] sm:$0xff] %v84_v14  ;;  %v94_v16 = vadd.f32 %v93_v15, %v92_v13 }
  0x1f   :  { %105 = vst [vmem:[#allocation10 + $0x10] sm:$0xff] %v94_v16 }
  0x20   :  { %116 = dma.vmem_to_hbm [thread:$0]  %s112_s1, 384, %s114_s23, [#allocation7]  }
  0x21   :  { %213 = dma.done.wait [#allocation7], 384  }
  0x22   :  { %214 = vsyncadd [#allocation7], 4294966912 }
  0x23   :  { %121 = vsyncpa [#allocation6], 1 }
  0x24   :  { %122 = vsyncpa [#allocation9], 1 }
  0x25   :  { %123 = vsyncpa [#allocation7], 1 }

</bundles_post_ra>
